<compile_context>
chip_gen: v6e
topology: v6e:2x2x1
jax: 0.10.0
libtpu: 0.0.40
codegen_flags: <defaults>
</compile_context>

<pallas_src>
import functools

import jax
import jax.numpy as jnp
from jax import lax
from jax.experimental import pallas as pl
from jax.experimental.pallas import tpu as pltpu


def _se_kernel(x_ref, w1t_ref, w2t_ref, o_ref, acc_ref, *, hw_total, hw_tile):
    # x_ref:   (B_t, C, hw_tile)  native dtype
    # w1t_ref: (C, Cr)  f32       (W1.T, W1 is (Cr, C))
    # w2t_ref: (Cr, C)  f32       (W2.T, W2 is (C, Cr))
    # o_ref:   (B_t, C) x.dtype
    # acc_ref: (B_t, C) f32       pooling accumulator (persists across HW steps)
    hw_step = pl.program_id(1)

    @pl.when(hw_step == 0)
    def _():
        acc_ref[...] = jnp.zeros_like(acc_ref)

    x = x_ref[...].astype(jnp.float32)  # upconvert (v5e has no bf16 VPU); sum in f32

    if hw_total % hw_tile != 0:
        # Boundary HW tile: zero out lanes past the true spatial extent.
        lane = lax.broadcasted_iota(jnp.int32, x.shape, x.ndim - 1)
        valid = hw_total - hw_step * hw_tile
        x = jnp.where(lane < valid, x, 0.0)

    acc_ref[...] += jnp.sum(x, axis=-1)  # partial sum for this HW tile

    @pl.when(hw_step == pl.num_programs(1) - 1)
    def _():
        pooled = acc_ref[...] * (1.0 / float(hw_total))                 # (B_t, C) mean
        h = jnp.dot(pooled, w1t_ref[...],
                    preferred_element_type=jnp.float32)                 # (B_t, Cr)
        h = jnp.maximum(h, 0.0)                                         # ReLU
        y = jnp.dot(h, w2t_ref[...],
                    preferred_element_type=jnp.float32)                 # (B_t, C)
        o_ref[...] = jax.nn.sigmoid(y).astype(o_ref.dtype)              # Sigmoid


def _pick_tiles(b, c, hw, itemsize, *, budget_bytes=8 << 20,
                hw_tile_cap=1024, b_tile_cap=8):
    """Pick (b_tile, hw_tile). hw_tile is a multiple of 128 (or the full hw if hw < 128);
    b_tile is either the full batch or 8 (keeps the (B_t, C) output block layout-legal)."""
    b_tile = b if b <= b_tile_cap else b_tile_cap
    if hw >= 128:
        hw_tile = min((hw // 128) * 128, hw_tile_cap)
        while b_tile * c * hw_tile * itemsize > budget_bytes and hw_tile > 128:
            hw_tile -= 128
    else:
        hw_tile = hw  # full (unaligned) extent in a single block
    return b_tile, hw_tile


def se_layer(x, w1, w2):
    """x: (b, c, h, w) NCHW, any float dtype; w1: (c//r, c); w2: (c, c//r).
    Returns the SE gate of shape (b, c, 1, 1) in x.dtype."""
    b, c, h, w = x.shape
    cr = w1.shape[0]
    assert w1.shape == (cr, c) and w2.shape == (c, cr)
    hw = h * w

    # No wrapper upcast of x: keep native dtype (bf16 halves HBM traffic on real nets).
    x_flat = x.reshape(b, c, hw)
    w1t = jnp.transpose(w1).astype(jnp.float32)   # (c, cr)
    w2t = jnp.transpose(w2).astype(jnp.float32)   # (cr, c)

    b_tile, hw_tile = _pick_tiles(b, c, hw, jnp.dtype(x.dtype).itemsize)
    grid = (pl.cdiv(b, b_tile), pl.cdiv(hw, hw_tile))   # reduction (HW) axis last

    kernel = functools.partial(_se_kernel, hw_total=hw, hw_tile=hw_tile)

    out = pl.pallas_call(
        kernel,
        out_shape=jax.ShapeDtypeStruct((b, c), x.dtype),
        grid_spec=pltpu.PrefetchScalarGridSpec(
            num_scalar_prefetch=0,
            grid=grid,
            in_specs=[
                pl.BlockSpec((b_tile, c, hw_tile), lambda bi, hi: (bi, 0, hi)),
                pl.BlockSpec((c, cr), lambda bi, hi: (0, 0)),   # resident across HW steps
                pl.BlockSpec((cr, c), lambda bi, hi: (0, 0)),   # resident across HW steps
            ],
            out_specs=pl.BlockSpec((b_tile, c), lambda bi, hi: (bi, 0)),
            scratch_shapes=[pltpu.VMEM((b_tile, c), jnp.float32)],
        ),
        compiler_params=pltpu.CompilerParams(
            dimension_semantics=("parallel", "arbitrary"),
        ),
    )(x_flat, w1t, w2t)

    return out.reshape(b, c, 1, 1)


def se_layer_ref(x, w1, w2):
    """Pure-JAX reference matching the PyTorch forward (math in f32)."""
    b, c, _, _ = x.shape
    y = jnp.mean(x.astype(jnp.float32), axis=(2, 3))          # (b, c)
    y = jnp.maximum(y @ w1.T.astype(jnp.float32), 0.0)        # (b, c//r)
    y = jax.nn.sigmoid(y @ w2.T.astype(jnp.float32))          # (b, c)
    return y.reshape(b, c, 1, 1).astype(x.dtype)


if __name__ == "__main__":
    key = jax.random.PRNGKey(0)

    def run_case(b, c, h, w, reduction, dtype, atol):
        cr = max(1, c // reduction)
        kx, k1, k2 = jax.random.split(jax.random.fold_in(key, c * h * w), 3)
        x = jax.random.normal(kx, (b, c, h, w), dtype=jnp.float32).astype(dtype)
        # PyTorch Linear weight layout: (out, in)
        w1 = jax.random.normal(k1, (cr, c), dtype=jnp.float32) * 0.1
        w2 = jax.random.normal(k2, (c, cr), dtype=jnp.float32) * 0.1

        out = jax.block_until_ready(se_layer(x, w1, w2))
        ref = se_layer_ref(x, w1, w2)
        assert out.shape == (b, c, 1, 1), out.shape
        err = float(jnp.max(jnp.abs(out.astype(jnp.float32) - ref.astype(jnp.float32))))
        assert err <= atol, (b, c, h, w, dtype, err)

    # SELayer(channel=64, reduction=16) -> hidden = 4 ; small single-step case.
    run_case(2, 64, 8, 8, 16, jnp.float32, 1e-5)
    # Exercise the multi-step HW grid + boundary masking path (hw=400, tile=384).
    run_case(2, 64, 20, 20, 16, jnp.float32, 1e-5)
    # Native bf16 input (halved HBM traffic), f32 accumulation inside the kernel.
    run_case(2, 64, 16, 16, 16, jnp.bfloat16, 2e-2)

    print("KERNEL_OK")
</pallas_src>

<mosaic_0001>
module attributes {stable_mosaic.version = 11 : i64} {
  func.func @_se_kernel(%arg0: i32, %arg1: i32, %arg2: memref<2x64x64xf32, #tpu.memory_space<vmem>>, %arg3: memref<64x4xf32, #tpu.memory_space<vmem>>, %arg4: memref<4x64xf32, #tpu.memory_space<vmem>>, %arg5: memref<2x64xf32, #tpu.memory_space<vmem>>, %arg6: memref<2x64xf32, #tpu.memory_space<vmem>>) attributes {dimension_semantics = [#tpu.dimension_semantics<parallel>, #tpu.dimension_semantics<arbitrary>], iteration_bounds = array<i64: 1, 1>, scalar_prefetch = 0 : i64, scratch_operands = 1 : i64, tpu.core_type = #tpu.core_type<tc>, window_params = [{transform_indices = @transform_0, window_bounds = array<i64: 2, 64, 64>}, {pipeline_mode = #tpu.pipeline_mode<synchronous>, transform_indices = @transform_1, window_bounds = array<i64: 64, 4>}, {pipeline_mode = #tpu.pipeline_mode<synchronous>, transform_indices = @transform_2, window_bounds = array<i64: 4, 64>}, {transform_indices = @transform_3, window_bounds = array<i64: 2, 64>}]} {
    %c0_i32 = arith.constant 0 : i32
    %0 = arith.cmpi eq, %arg1, %c0_i32 : i32
    %1 = arith.extui %0 : i1 to i32
    %c0_i32_0 = arith.constant 0 : i32
    %2 = arith.cmpi ne, %1, %c0_i32_0 : i32
    scf.if %2 {
      %cst_9 = arith.constant 0.000000e+00 : f32
      %11 = vector.broadcast %cst_9 : f32 to vector<2x64xf32>
      %c0_10 = arith.constant 0 : index
      %c0_11 = arith.constant 0 : index
      %12 = vector.load %arg6[%c0_10, %c0_11] : memref<2x64xf32, #tpu.memory_space<vmem>>, vector<2x64xf32>
      tpu.vector_store %arg6[%c0_10, %c0_11], %11 {strides = array<i32>} : memref<2x64xf32, #tpu.memory_space<vmem>>, vector<2x64xf32>,
    } else {
    }
    %c0 = arith.constant 0 : index
    %c0_1 = arith.constant 0 : index
    %c0_2 = arith.constant 0 : index
    %3 = vector.load %arg2[%c0, %c0_1, %c0_2] : memref<2x64x64xf32, #tpu.memory_space<vmem>>, vector<2x64x64xf32>
    %c0_3 = arith.constant 0 : index
    %c0_4 = arith.constant 0 : index
    %4 = vector.load %arg6[%c0_3, %c0_4] : memref<2x64xf32, #tpu.memory_space<vmem>>, vector<2x64xf32>
    %cst = arith.constant dense<0.000000e+00> : vector<2x64xf32>
    %5 = vector.multi_reduction <add>, %3, %cst [2] : vector<2x64x64xf32> to vector<2x64xf32>
    %6 = arith.addf %4, %5 : vector<2x64xf32>
    %c0_5 = arith.constant 0 : index
    %c0_6 = arith.constant 0 : index
    %7 = vector.load %arg6[%c0_5, %c0_6] : memref<2x64xf32, #tpu.memory_space<vmem>>, vector<2x64xf32>
    tpu.vector_store %arg6[%c0_5, %c0_6], %6 {strides = array<i32>} : memref<2x64xf32, #tpu.memory_space<vmem>>, vector<2x64xf32>,
    %c0_i32_7 = arith.constant 0 : i32
    %8 = arith.cmpi eq, %arg1, %c0_i32_7 : i32
    %9 = arith.extui %8 : i1 to i32
    %c0_i32_8 = arith.constant 0 : i32
    %10 = arith.cmpi ne, %9, %c0_i32_8 : i32
    scf.if %10 {
      %c0_9 = arith.constant 0 : index
      %c0_10 = arith.constant 0 : index
      %11 = vector.load %arg6[%c0_9, %c0_10] : memref<2x64xf32, #tpu.memory_space<vmem>>, vector<2x64xf32>
      %cst_11 = arith.constant 1.562500e-02 : f32
      %12 = vector.broadcast %cst_11 : f32 to vector<2x64xf32>
      %13 = arith.mulf %11, %12 : vector<2x64xf32>
      %c0_12 = arith.constant 0 : index
      %c0_13 = arith.constant 0 : index
      %14 = vector.load %arg3[%c0_12, %c0_13] : memref<64x4xf32, #tpu.memory_space<vmem>>, vector<64x4xf32>
      %cst_14 = arith.constant dense<0.000000e+00> : vector<2x4xf32>
      %15 = tpu.matmul %13, %14, %cst_14 {dimension_numbers = #tpu.dot_dimension_numbers<[1], [0], [0], [1], [0, 0, 1, 1], [], []>} : vector<2x64xf32>, vector<64x4xf32>, vector<2x4xf32> -> vector<2x4xf32>
      %cst_15 = arith.constant 0.000000e+00 : f32
      %16 = vector.broadcast %cst_15 : f32 to vector<2x4xf32>
      %17 = arith.maximumf %15, %16 : vector<2x4xf32>
      %c0_16 = arith.constant 0 : index
      %c0_17 = arith.constant 0 : index
      %18 = vector.load %arg4[%c0_16, %c0_17] : memref<4x64xf32, #tpu.memory_space<vmem>>, vector<4x64xf32>
      %cst_18 = arith.constant dense<0.000000e+00> : vector<2x64xf32>
      %19 = tpu.matmul %17, %18, %cst_18 {dimension_numbers = #tpu.dot_dimension_numbers<[1], [0], [0], [1], [0, 0, 1, 1], [], []>} : vector<2x4xf32>, vector<4x64xf32>, vector<2x64xf32> -> vector<2x64xf32>
      %20 = arith.negf %19 : vector<2x64xf32>
      %21 = math.exp %20 : vector<2x64xf32>
      %cst_19 = arith.constant 1.000000e+00 : f32
      %22 = vector.broadcast %cst_19 : f32 to vector<2x64xf32>
      %23 = arith.addf %22, %21 : vector<2x64xf32>
      %24 = arith.divf %22, %23 : vector<2x64xf32>
      %c0_20 = arith.constant 0 : index
      %c0_21 = arith.constant 0 : index
      %25 = vector.load %arg5[%c0_20, %c0_21] : memref<2x64xf32, #tpu.memory_space<vmem>>, vector<2x64xf32>
      tpu.vector_store %arg5[%c0_20, %c0_21], %24 {strides = array<i32>} : memref<2x64xf32, #tpu.memory_space<vmem>>, vector<2x64xf32>,
    } else {
    }
    return
  }
  func.func @transform_0(%arg0: i32, %arg1: i32) -> (i32, i32, i32) {
    %c0_i32 = arith.constant 0 : i32
    %c0_i32_0 = arith.constant 0 : i32
    return %arg0, %c0_i32, %arg1 : i32, i32, i32
  }
  func.func @transform_1(%arg0: i32, %arg1: i32) -> (i32, i32) {
    %c0_i32 = arith.constant 0 : i32
    %c0_i32_0 = arith.constant 0 : i32
    %c0_i32_1 = arith.constant 0 : i32
    return %c0_i32, %c0_i32_0 : i32, i32
  }
  func.func @transform_2(%arg0: i32, %arg1: i32) -> (i32, i32) {
    %c0_i32 = arith.constant 0 : i32
    %c0_i32_0 = arith.constant 0 : i32
    %c0_i32_1 = arith.constant 0 : i32
    return %c0_i32, %c0_i32_0 : i32, i32
  }
  func.func @transform_3(%arg0: i32, %arg1: i32) -> (i32, i32) {
    %c0_i32 = arith.constant 0 : i32
    %c0_i32_0 = arith.constant 0 : i32
    return %arg0, %c0_i32 : i32, i32
  }
}

</mosaic_0001>

<bundles_post_ra>
// kernel: tpu_custom_call.1
= control target key start
LH: loop header
LB: loop body
LE: loop exit
PB: predicated region body
PF: predicated region fallthrough
CT: control target
= control target key end

     0   :  { %8 = vsyncpa [#allocation4], 0  ;;  %s587_s0 = inlined_call_operand.hbm [shape: f32[2,64,64], index: 0, kind: input, shape index: {}]   ;;  %s588_s1 = inlined_call_operand.vmem [shape: f32[64,4], index: 1, kind: input, shape index: {}]   ;;  %s589_s2 = inlined_call_operand.vmem [shape: f32[4,64], index: 2, kind: input, shape index: {}]   ;;  %s590_s3 = inlined_call_operand.hbm [shape: f32[2,64], index: 3, kind: output, shape index: {}]  }
   0x1   :  { %9 = vsyncpa [#allocation5], 0  ;;  %s498_s12 = smov [#allocation3]  }
   0x2   :  { %s15_s13 = sshll.u32 %s498_s12, 4  ;;  %s16_s13 = int_to_ptr.vmem [resolvable:$true] %s15_s13 }
   0x3   :  { %s462_s14 = scalar_lea.vmem %s16_s13, 2048  ;;  %p467_p1 = scmp.lt.s32.totalorder %s16_s13, %s16_s13 }
   0x4   :  { %p463_p0 = scmp.ne.s32.totalorder %s16_s13, %s462_s14  ;;  %p468_p2 = scmp.lt.s32.totalorder %s462_s14, %s462_s14 }
   0x6   :  { %p469_p3 = por %p468_p2, %p467_p1 }
   0x8   :  { %p470_p4 = pnand %p469_p3, %p463_p0 }
   0xa   :  { %473 = shalt.err (!%p470_p4)
}
   0xb   :  { %s499_s15 = smov 128   ;;  %s500_s16 = smov 8  }
   0xc   :  { %21 = dma.hbm_to_vmem [thread:$0]  %s587_s0, 2048, %s16_s13, [#allocation4], %s499_s15, %s499_s15, %s500_s16  }
   0xd   :  { %494 = dma.done.wait [#allocation4], 2048  }
   0xe   :  { %495 = vsyncadd [#allocation4], 4294965248  ;;  %vm52_vm0 = vcmask 523264   ;;  %v43_v0 = vld [vmem:[#allocation3 + $0x40] sm:$0xff]  ;;  %v44_v2 = vld [vmem:[#allocation3 + $0x48] sm:$0xff]  ;;  %vm33_vm1 = vcmask 517120   ;;  %v117_v45 = vlaneseq }
   0xf   :  { %v35_v1 = vld [vmem:[#allocation3] sm:$0xff]  ;;  %v77_v3 = vsel %vm52_vm0, %v43_v0, 0.0  ;;  %v36_v5 = vld [vmem:[#allocation3 + $0x8] sm:$0xff]  ;;  %v80_v6 = vsel %vm52_vm0, %v44_v2, 0.0  ;;  %v45_v8 = vld [vmem:[#allocation3 + $0x50] sm:$0xff]  ;;  %v501_v32 = vmov 0.0  }
  0x10   :  { %v53_v4 = vsel %vm52_vm0, %v35_v1, 0.0  ;;  %78 = vadd.xlane.f32.xlu1 %v77_v3  ;;  %v56_v7 = vsel %vm52_vm0, %v36_v5, 0.0  ;;  %v37_v9 = vld [vmem:[#allocation3 + $0x10] sm:$0xff]  ;;  %v83_v10 = vsel %vm52_vm0, %v45_v8, 0.0  ;;  %v46_v12 = vld [vmem:[#allocation3 + $0x58] sm:$0xff]  ;;  %v47_v16 = vld [vmem:[#allocation3 + $0x60] sm:$0xff]  ;;  %420 = vmatprep.subr.mxu0 %v501_v32 }
  0x11   :  { %54 = vadd.xlane.f32.xlu0 %v53_v4  ;;  %v59_v11 = vsel %vm52_vm0, %v37_v9, 0.0  ;;  %v38_v13 = vld [vmem:[#allocation3 + $0x18] sm:$0xff]  ;;  %v86_v14 = vsel %vm52_vm0, %v46_v12, 0.0  ;;  %v39_v17 = vld [vmem:[#allocation3 + $0x20] sm:$0xff]  ;;  %v89_v18 = vsel %vm52_vm0, %v47_v16, 0.0  ;;  %v48_v20 = vld [vmem:[#allocation3 + $0x68] sm:$0xff]  ;;  %439 = vmatprep.subr.mxu1 %v501_v32 }
  0x12   :  { %v62_v15 = vsel %vm52_vm0, %v38_v13, 0.0  ;;  %v65_v19 = vsel %vm52_vm0, %v39_v17, 0.0  ;;  %v40_v21 = vld [vmem:[#allocation3 + $0x28] sm:$0xff]  ;;  %v92_v22 = vsel %vm52_vm0, %v48_v20, 0.0  ;;  %v49_v24 = vld [vmem:[#allocation3 + $0x70] sm:$0xff]  ;;  %v50_v28 = vld [vmem:[#allocation3 + $0x78] sm:$0xff] }
  0x13   :  { %v68_v23 = vsel %vm52_vm0, %v40_v21, 0.0  ;;  %v41_v25 = vld [vmem:[#allocation3 + $0x30] sm:$0xff]  ;;  %v95_v26 = vsel %vm52_vm0, %v49_v24, 0.0  ;;  %v42_v29 = vld [vmem:[#allocation3 + $0x38] sm:$0xff]  ;;  %v98_v30 = vsel %vm52_vm0, %v50_v28, 0.0  ;;  %v227_v35 = vld [vmem:[%s588_s1 + $0x28] sm:$0xff] }
  0x14   :  { %81 = vadd.xlane.f32.xlu1 %v80_v6  ;;  %v71_v27 = vsel %vm52_vm0, %v41_v25, 0.0  ;;  %v74_v31 = vsel %vm52_vm0, %v42_v29, 0.0  ;;  %34 = vst.msk [vmem:[#allocation2] sm:$0x3] %vm33_vm1, %v501_v32  ;;  %v229_v33 = vld [vmem:[%s588_s1 + $0x38] sm:$0xff]  ;;  %v228_v34 = vld [vmem:[%s588_s1 + $0x30] sm:$0xff] }
  0x15   :  { %57 = vadd.xlane.f32.xlu0 %v56_v7  ;;  %421 = vmatpush3.msra.mxu0 %v229_v33  ;;  %v226_v36 = vld [vmem:[%s588_s1 + $0x20] sm:$0xff]  ;;  %v225_v37 = vld [vmem:[%s588_s1 + $0x18] sm:$0xff]  ;;  %vm502_vm2 = vmmov 0   ;;  %v224_v38 = vld [vmem:[%s588_s1 + $0x10] sm:$0xff]  ;;  %v118_v48 = vand.u32 127, %v117_v45  ;;  %v120_v53 = vshrl.u32 %v117_v45, 7 }
  0x16   :  { %422 = vmatprep.subr.mxu0 %v501_v32  ;;  %436 = vmatprep.mubr.msk.f32.mxu0 %vm502_vm2, %v501_v32  ;;  %v223_v39 = vld [vmem:[%s588_s1 + $0x8] sm:$0xff]  ;;  %v222_v40 = vld [vmem:[%s588_s1] sm:$0xff]  ;;  %vm128_vm3 = vcmask 130112   ;;  %vm135_vm4 = vcmask 195712   ;;  %vm142_vm5 = vcmask 261312   ;;  %vm149_vm6 = vcmask 326912  }
  0x17   :  { %423 = vmatpush3.msra.mxu0 %v228_v34  ;;  %441 = vmatprep.mubr.msk.f32.mxu1 %vm502_vm2, %v501_v32  ;;  %v123_v51 = vadd.s32 4294967288, %v118_v48  ;;  %v130_v52 = vadd.s32 4294967280, %v118_v48  ;;  %v137_v54 = vadd.s32 4294967272, %v118_v48  ;;  %v144_v55 = vadd.s32 4294967264, %v118_v48  ;;  %s503_s8 = smov [#allocation6]  }
  0x18   :  { %84 = vadd.xlane.f32.xlu1 %v83_v10  ;;  %424 = vmatprep.subr.mxu0 %v501_v32  ;;  %v151_v59 = vadd.s32 4294967256, %v118_v48  ;;  %v158_v61 = vadd.s32 4294967248, %v118_v48  ;;  %v121_v62 = vsub.s32 %v118_v48, %v120_v53  ;;  %v165_v3 = vadd.s32 4294967240, %v118_v48  ;;  %s396_s9 = sshll.u32 %s503_s8, 4  ;;  %s397_s9 = int_to_ptr.vmem [resolvable:$true] %s396_s9 }
  0x19   :  { %60 = vadd.xlane.f32.xlu0 %v59_v11  ;;  %425 = vmatpush3.msra.mxu0 %v227_v35  ;;  %v126_v58 = vsub.s32 %v123_v51, %v120_v53  ;;  %v133_v60 = vsub.s32 %v130_v52, %v120_v53  ;;  %v140_v63 = vsub.s32 %v137_v54, %v120_v53  ;;  %vm156_vm7 = vcmask 392512   ;;  %p479_p6 = scmp.lt.s32.totalorder %s397_s9, %s397_s9 }
  0x1a   :  { %426 = vmatprep.subr.mxu0 %v501_v32  ;;  %v147_v0 = vsub.s32 %v144_v55, %v120_v53  ;;  %v154_v6 = vsub.s32 %v151_v59, %v120_v53  ;;  %v161_v9 = vsub.s32 %v158_v61, %v120_v53  ;;  %vm163_vm8 = vcmask 458112  }
  0x1b   :  { %427 = vmatpush3.msra.mxu0 %v226_v36  ;;  %vm170_vm9 = vcmask 523712   ;;  %vm211_vm10 = vcmask 1041409   ;;  %vm309_vm11 = vcmask 1043456   ;;  %vm305_vm12 = vcmask 31744  }
  0x1c   :  { %87 = vadd.xlane.f32.xlu1 %v86_v14  ;;  %428 = vmatprep.subr.mxu0 %v501_v32 }
  0x1d   :  { %63 = vadd.xlane.f32.xlu0 %v62_v15  ;;  %429 = vmatpush3.msra.mxu0 %v225_v37 }
  0x1e   :  { %430 = vmatprep.subr.mxu0 %v501_v32 }
  0x1f   :  { %431 = vmatpush3.msra.mxu0 %v224_v38 }
  0x20   :  { %90 = vadd.xlane.f32.xlu1 %v89_v18  ;;  %432 = vmatprep.subr.mxu0 %v501_v32  ;;  %v168_v18 = vsub.s32 %v165_v3, %v120_v53 }
  0x21   :  { %66 = vadd.xlane.f32.xlu0 %v65_v19  ;;  %433 = vmatpush3.msra.mxu0 %v223_v39  ;;  %v51_v39 = vld [vmem:[#allocation2] sm:$0x3] }
  0x22   :  { %434 = vmatprep.subr.mxu0 %v501_v32 }
  0x23   :  { %435 = vmatpush3.msra.mxu0 %v222_v40 }
  0x24   :  { %93 = vadd.xlane.f32.xlu1 %v92_v22 }
  0x25   :  { %69 = vadd.xlane.f32.xlu0 %v68_v23 }
  0x28   :  { %96 = vadd.xlane.f32.xlu1 %v95_v26 }
  0x29   :  { %72 = vadd.xlane.f32.xlu0 %v71_v27 }
  0x2c   :  { %99 = vadd.xlane.f32.xlu1 %v98_v30 }
  0x2d   :  { %75 = vadd.xlane.f32.xlu0 %v74_v31 }
  0x99   :  { %v79_v41 = vpop.xlane.xlu1 %78 }
  0x9a   :  { %v55_v42 = vpop.xlane.xlu0 %54  ;;  %v175_v10 = vrot.slane %v79_v41, %v121_v62 }
  0x9b   :  { %v122_v11 = vrot.slane %v55_v42, %v121_v62 }
  0x9d   :  { %v82_v43 = vpop.xlane.xlu1 %81 }
  0x9e   :  { %v58_v44 = vpop.xlane.xlu0 %57  ;;  %v179_v4 = vrot.slane %v82_v43, %v126_v58 }
  0x9f   :  { %v127_v5 = vrot.slane %v58_v44, %v126_v58 }
  0xa0   :  { %v180_v19 = vsel %vm128_vm3, %v179_v4, %v175_v10 }
  0xa1   :  { %v85_v46 = vpop.xlane.xlu1 %84  ;;  %v129_v20 = vsel %vm128_vm3, %v127_v5, %v122_v11 }
  0xa2   :  { %v61_v47 = vpop.xlane.xlu0 %60  ;;  %v184_v7 = vrot.slane %v85_v46, %v133_v60  ;;  %v304_v46 = vld [vmem:[%s589_s2] sm:$0xf]  ;;  %s474_s2 = scalar_lea.vmem %s397_s9, 32 }
  0xa3   :  { %v134_v8 = vrot.slane %v61_v47, %v133_v60  ;;  %440 = vmatpush3.msk.msra.mxu1 %vm309_vm11, %v304_v46  ;;  %p475_p5 = scmp.ne.s32.totalorder %s397_s9, %s474_s2  ;;  %p480_p7 = scmp.lt.s32.totalorder %s474_s2, %s474_s2 }
  0xa4   :  { %v185_v23 = vsel %vm135_vm4, %v184_v7, %v180_v19 }
  0xa5   :  { %v88_v49 = vpop.xlane.xlu1 %87  ;;  %v136_v24 = vsel %vm135_vm4, %v134_v8, %v129_v20  ;;  %p481_p8 = por %p480_p7, %p479_p6 }
  0xa6   :  { %v64_v50 = vpop.xlane.xlu0 %63  ;;  %v189_v12 = vrot.slane %v88_v49, %v140_v63 }
  0xa7   :  { %v141_v13 = vrot.slane %v64_v50, %v140_v63  ;;  %p482_p9 = pnand %p481_p8, %p475_p5 }
  0xa8   :  { %v190_v27 = vsel %vm142_vm5, %v189_v12, %v185_v23 }
  0xa9   :  { %v91_v56 = vpop.xlane.xlu1 %90  ;;  %v143_v28 = vsel %vm142_vm5, %v141_v13, %v136_v24 }
  0xaa   :  { %v67_v57 = vpop.xlane.xlu0 %66  ;;  %v194_v14 = vrot.slane %v91_v56, %v147_v0 }
  0xab   :  { %v148_v15 = vrot.slane %v67_v57, %v147_v0 }
  0xac   :  { %v195_v29 = vsel %vm149_vm6, %v194_v14, %v190_v27 }
  0xad   :  { %v94_v1 = vpop.xlane.xlu1 %93  ;;  %v150_v30 = vsel %vm149_vm6, %v148_v15, %v143_v28 }
  0xae   :  { %v70_v2 = vpop.xlane.xlu0 %69  ;;  %v199_v21 = vrot.slane %v94_v1, %v154_v6 }
  0xaf   :  { %v155_v22 = vrot.slane %v70_v2, %v154_v6 }
  0xb0   :  { %v200_v33 = vsel %vm156_vm7, %v199_v21, %v195_v29 }
  0xb1   :  { %v97_v16 = vpop.xlane.xlu1 %96  ;;  %v157_v34 = vsel %vm156_vm7, %v155_v22, %v150_v30 }
  0xb2   :  { %v73_v17 = vpop.xlane.xlu0 %72  ;;  %v204_v25 = vrot.slane %v97_v16, %v161_v9 }
  0xb3   :  { %v162_v26 = vrot.slane %v73_v17, %v161_v9 }
  0xb4   :  { %v205_v37 = vsel %vm163_vm8, %v204_v25, %v200_v33 }
  0xb5   :  { %v100_v31 = vpop.xlane.xlu1 %99  ;;  %v164_v38 = vsel %vm163_vm8, %v162_v26, %v157_v34 }
  0xb6   :  { %v76_v32 = vpop.xlane.xlu0 %75  ;;  %v209_v35 = vrot.slane %v100_v31, %v168_v18 }
  0xb7   :  { %v169_v36 = vrot.slane %v76_v32, %v168_v18 }
  0xb8   :  { %v210_v40 = vsel %vm170_vm9, %v209_v35, %v205_v37 }
  0xb9   :  { %v171_v41 = vsel %vm170_vm9, %v169_v36, %v164_v38 }
  0xba   :  { %v212_v42 = vsel %vm211_vm10, %v210_v40, %v171_v41 }
  0xbb   :  { %v214_v43 = vadd.f32 %v212_v42, %v51_v39 }
  0xbd   :  { %216 = vst.msk [vmem:[#allocation2] sm:$0x3] %vm33_vm1, %v214_v43 }
  0xc4   :  { %v220_v44 = vld [vmem:[#allocation2] sm:$0x3] }
  0xc5   :  { %v221_v45 = vmul.f32 0.015625, %v220_v44 }
  0xc7   :  { %437 = vmatmul.mubr.msk.f32.vlgmr.msra.gmra.mxu0 %vm52_vm0, %v221_v45 }
 0x187   :  { %v299_v47 = vpop.f32.mrf.mxu0 }
 0x188   :  { %v303_v48 = vmax.f32 %v299_v47, 0.0 }
 0x189   :  { %v438_v49 = vpop.f32.mrf.mxu0 }
 0x18a   :  { %442 = vmatmul.mubr.msk.f32.vlgmr.msra.gmra.mxu1 %vm305_vm12, %v303_v48 }
 0x24a   :  { %v379_v50 = vpop.f32.mrf.mxu1 }
 0x24b   :  { %v408_v51 = vmul.f32 -1.442695, %v379_v50 }
 0x24c   :  { %v443_v52 = vpop.f32.mrf.mxu1 }
 0x24d   :  { %450 = vpow2.f32 %v408_v51 }
 0x25a   :  { %v451_v53 = vpop.eup %450 }
 0x25b   :  { %v386_v54 = vadd.f32 1.0, %v451_v53 }
 0x25d   :  { %452 = vrcp.f32 %v386_v54 }
 0x26a   :  { %v453_v55 = vpop.eup %452 }
 0x26b   :  { %389 = vst.msk [vmem:[#allocation6] sm:$0x3] %vm33_vm1, %v453_v55 }
 0x26c   :  { %485 = shalt.err (!%p482_p9)
}
 0x26d   :  { %399 = dma.vmem_to_hbm [thread:$0]  %s397_s9, 32, %s590_s3, [#allocation5]  }
 0x26e   :  { %496 = dma.done.wait [#allocation5], 32  }
 0x26f   :  { %497 = vsyncadd [#allocation5], 4294967264 }
 0x270   :  { %403 = vsyncpa [#allocation4], 1 }
 0x271   :  { %404 = vsyncpa [#allocation5], 1 }

</bundles_post_ra>
